<compile_context>
chip_gen: v7x
topology: tpu7x:2x2x1
jax: 0.10.0
libtpu: 0.0.40
codegen_flags: <defaults>
</compile_context>

<pallas_src>
import functools
from functools import partial

import numpy as np
import jax
import jax.numpy as jnp
from jax import lax
from jax.experimental import pallas as pl
from jax.experimental.pallas import tpu as pltpu

NEGATIVE_SLOPE = 1.0

CONV_STRIDE = 3
CONV_PAD = 1
CONV_DIL = 4          # no-op for kernel_size == 1
POOL_K = 2
POOL_STRIDE = 3
POOL_PAD = 1


def _out_dims(H, W):
    # Conv2d(k=1): effective kernel extent = dilation*(k-1)+1 = 1
    Ho = (H + 2 * CONV_PAD - 1) // CONV_STRIDE + 1
    Wo = (W + 2 * CONV_PAD - 1) // CONV_STRIDE + 1
    Po = (Ho + 2 * POOL_PAD - POOL_K) // POOL_STRIDE + 1
    Qo = (Wo + 2 * POOL_PAD - POOL_K) // POOL_STRIDE + 1
    return Ho, Wo, Po, Qo


@functools.lru_cache(maxsize=None)
def _sel_consts(H, W):
    """Compile-time constants folding conv pad/stride sampling + AvgPool2d(2,3,1).

    Tt[hw, pq]     : 0 or 1/4 -- raw input pixel hw contributes (with the pool
                     1/4 averaging already applied) to pooled output pq.
    cnt_over_4[pq] : (# in-bounds conv taps in the pool window)/4, scales the
                     conv bias (count_include_pad=True -> divisor always 4).
    """
    Ho, Wo, Po, Qo = _out_dims(H, W)
    PQ = Po * Qo
    T = np.zeros((PQ, H * W), dtype=np.float32)
    cnt = np.zeros((PQ,), dtype=np.float32)
    # Tiny loops (PQ x 4 taps); vectorize with numpy if shapes ever grow large.
    for po in range(Po):
        for qo in range(Qo):
            pq = po * Qo + qo
            for dr in range(POOL_K):
                for dc in range(POOL_K):
                    r = POOL_STRIDE * po - POOL_PAD + dr   # conv-output row
                    c = POOL_STRIDE * qo - POOL_PAD + dc   # conv-output col
                    if 0 <= r < Ho and 0 <= c < Wo:
                        cnt[pq] += 1.0                      # bias contributes
                        rr = CONV_STRIDE * r - CONV_PAD     # raw-input row
                        cc = CONV_STRIDE * c - CONV_PAD     # raw-input col
                        if 0 <= rr < H and 0 <= cc < W:     # else conv pad -> 0
                            T[pq, rr * W + cc] += 1.0 / (POOL_K * POOL_K)
    cnt_over_4 = (cnt / float(POOL_K * POOL_K)).reshape(1, PQ)
    return np.ascontiguousarray(T.T), cnt_over_4            # (H*W, PQ), (1, PQ)


def _make_kernel(N, negative_slope):
    def kernel(x_ref, t_ref, w_ref, b_ref, cnt_ref, o_ref):
        # x_ref  : (N, Cin, H*W)  raw NCHW input, spatial flattened
        # t_ref  : (H*W, PQ)      constant selection matrix
        # w_ref  : (Cout, Cin)    conv weight (k=1 squeezed)
        # b_ref  : (Cout, 1)      conv bias
        # cnt_ref: (1, PQ)        valid-tap count / 4
        # o_ref  : (N, Cout, PQ)  output, already in NCHW channel-major order
        brow = b_ref[...] * cnt_ref[...]                    # (Cout, PQ), hoisted
        t = t_ref[...]
        w = w_ref[...]
        for n in range(N):                                   # N tiny: static unroll
            y = jnp.dot(x_ref[n], t,
                        preferred_element_type=jnp.float32)  # (Cin, PQ)
            v = jnp.dot(w, y,
                        preferred_element_type=jnp.float32) + brow  # (Cout, PQ)
            if negative_slope != 1.0:
                v = jnp.where(v > 0, v, v * negative_slope)
            # slope == 1: where() is an exact identity -> elided at trace time
            o_ref[n] = v

    return kernel


@partial(jax.jit, static_argnames=("negative_slope",))
def model_forward(x, weight, bias, negative_slope=NEGATIVE_SLOPE):
    """x: NCHW float32 [N, 8, H, W]; weight: [32, 8, 1, 1]; bias: [32]."""
    N, Cin, H, W = x.shape
    Cout = weight.shape[0]
    # Selection-matrix fold assumes kernel_size == 1 (dilation is then a no-op).
    assert weight.shape[1:] == (Cin, 1, 1), "requires Conv2d kernel_size == 1"

    Ho, Wo, Po, Qo = _out_dims(H, W)
    PQ = Po * Qo
    Tt_np, cnt_np = _sel_consts(H, W)

    vmem = pl.BlockSpec(memory_space=pltpu.MemorySpace.VMEM)
    out = pl.pallas_call(
        _make_kernel(N, float(negative_slope)),
        out_shape=jax.ShapeDtypeStruct((N, Cout, PQ), jnp.float32),
        in_specs=[vmem, vmem, vmem, vmem, vmem],
        out_specs=vmem,
    )(
        x.reshape(N, Cin, H * W).astype(jnp.float32),        # free reshape
        jnp.asarray(Tt_np),                                  # jit constant
        weight.reshape(Cout, Cin).astype(jnp.float32),       # free reshape
        bias.reshape(Cout, 1).astype(jnp.float32),           # free reshape
        jnp.asarray(cnt_np),                                 # jit constant
    )
    # Output is already channel-major -> plain reshape, no transpose.
    return out.reshape(N, Cout, Po, Qo)


def _reference(x, weight, bias, negative_slope=NEGATIVE_SLOPE):
    # pure-JAX reference for sanity checking
    conv = lax.conv_general_dilated(
        x, weight, window_strides=(CONV_STRIDE, CONV_STRIDE),
        padding=((CONV_PAD, CONV_PAD), (CONV_PAD, CONV_PAD)),
        rhs_dilation=(CONV_DIL, CONV_DIL),
        dimension_numbers=("NCHW", "OIHW", "NCHW"))
    conv = conv + bias.reshape(1, -1, 1, 1)
    convp = jnp.pad(conv, ((0, 0), (0, 0), (POOL_PAD, POOL_PAD), (POOL_PAD, POOL_PAD)))
    summed = lax.reduce_window(convp, 0.0, lax.add,
                               (1, 1, POOL_K, POOL_K),
                               (1, 1, POOL_STRIDE, POOL_STRIDE), "VALID")
    v2 = summed / float(POOL_K * POOL_K)
    return jnp.where(v2 > 0, v2, v2 * negative_slope)


if __name__ == "__main__":
    key = jax.random.PRNGKey(0)
    kx, kw, kb = jax.random.split(key, 3)

    # Input consistent with Conv2d(8, 32, ...): [N=2, Cin=8, H=16, W=16]
    x = jax.random.normal(kx, (2, 8, 16, 16), dtype=jnp.float32)
    weight = jax.random.normal(kw, (32, 8, 1, 1), dtype=jnp.float32) * 0.1
    bias = jax.random.normal(kb, (32,), dtype=jnp.float32) * 0.1

    out = jax.block_until_ready(model_forward(x, weight, bias))
    ref = jax.block_until_ready(_reference(x, weight, bias))

    assert out.shape == ref.shape, (out.shape, ref.shape)
    np.testing.assert_allclose(np.asarray(out), np.asarray(ref),
                               rtol=1e-5, atol=1e-5)
    print("KERNEL_OK")
</pallas_src>

<mosaic_0001>
module attributes {stable_mosaic.version = 11 : i64} {
  func.func @kernel(%arg0: memref<2x8x256xf32, #tpu.memory_space<vmem>>, %arg1: memref<256x9xf32, #tpu.memory_space<vmem>>, %arg2: memref<32x8xf32, #tpu.memory_space<vmem>>, %arg3: memref<32x1xf32, #tpu.memory_space<vmem>>, %arg4: memref<1x9xf32, #tpu.memory_space<vmem>>, %arg5: memref<2x32x9xf32, #tpu.memory_space<vmem>>) attributes {dimension_semantics = [], scalar_prefetch = 0 : i64, scratch_operands = 0 : i64, tpu.core_type = #tpu.core_type<tc>} {
    %c0 = arith.constant 0 : index
    %c0_0 = arith.constant 0 : index
    %0 = vector.load %arg3[%c0, %c0_0] : memref<32x1xf32, #tpu.memory_space<vmem>>, vector<32x1xf32>
    %c0_1 = arith.constant 0 : index
    %c0_2 = arith.constant 0 : index
    %1 = vector.load %arg4[%c0_1, %c0_2] : memref<1x9xf32, #tpu.memory_space<vmem>>, vector<1x9xf32>
    %2 = vector.broadcast %0 : vector<32x1xf32> to vector<32x9xf32>
    %3 = vector.broadcast %1 : vector<1x9xf32> to vector<32x9xf32>
    %4 = arith.mulf %2, %3 : vector<32x9xf32>
    %c0_3 = arith.constant 0 : index
    %c0_4 = arith.constant 0 : index
    %5 = vector.load %arg1[%c0_3, %c0_4] : memref<256x9xf32, #tpu.memory_space<vmem>>, vector<256x9xf32>
    %c0_5 = arith.constant 0 : index
    %c0_6 = arith.constant 0 : index
    %6 = vector.load %arg2[%c0_5, %c0_6] : memref<32x8xf32, #tpu.memory_space<vmem>>, vector<32x8xf32>
    %c0_7 = arith.constant 0 : index
    %c0_8 = arith.constant 0 : index
    %c0_9 = arith.constant 0 : index
    %7 = vector.load %arg0[%c0_7, %c0_8, %c0_9] : memref<2x8x256xf32, #tpu.memory_space<vmem>>, vector<1x8x256xf32>
    %8 = vector.shape_cast %7 : vector<1x8x256xf32> to vector<8x256xf32>
    %cst = arith.constant dense<0.000000e+00> : vector<8x9xf32>
    %9 = tpu.matmul %8, %5, %cst {dimension_numbers = #tpu.dot_dimension_numbers<[1], [0], [0], [1], [0, 0, 1, 1], [], []>} : vector<8x256xf32>, vector<256x9xf32>, vector<8x9xf32> -> vector<8x9xf32>
    %cst_10 = arith.constant dense<0.000000e+00> : vector<32x9xf32>
    %10 = tpu.matmul %6, %9, %cst_10 {dimension_numbers = #tpu.dot_dimension_numbers<[1], [0], [0], [1], [0, 0, 1, 1], [], []>} : vector<32x8xf32>, vector<8x9xf32>, vector<32x9xf32> -> vector<32x9xf32>
    %11 = arith.addf %10, %4 : vector<32x9xf32>
    %c0_11 = arith.constant 0 : index
    %c0_12 = arith.constant 0 : index
    %c0_13 = arith.constant 0 : index
    %12 = vector.load %arg5[%c0_11, %c0_12, %c0_13] : memref<2x32x9xf32, #tpu.memory_space<vmem>>, vector<1x32x9xf32>
    %13 = vector.shape_cast %12 : vector<1x32x9xf32> to vector<32x9xf32>
    %14 = vector.shape_cast %11 : vector<32x9xf32> to vector<1x32x9xf32>
    tpu.vector_store %arg5[%c0_11, %c0_12, %c0_13], %14 {strides = array<i32>} : memref<2x32x9xf32, #tpu.memory_space<vmem>>, vector<1x32x9xf32>,
    %c1 = arith.constant 1 : index
    %c0_14 = arith.constant 0 : index
    %c0_15 = arith.constant 0 : index
    %15 = vector.load %arg0[%c1, %c0_14, %c0_15] : memref<2x8x256xf32, #tpu.memory_space<vmem>>, vector<1x8x256xf32>
    %16 = vector.shape_cast %15 : vector<1x8x256xf32> to vector<8x256xf32>
    %cst_16 = arith.constant dense<0.000000e+00> : vector<8x9xf32>
    %17 = tpu.matmul %16, %5, %cst_16 {dimension_numbers = #tpu.dot_dimension_numbers<[1], [0], [0], [1], [0, 0, 1, 1], [], []>} : vector<8x256xf32>, vector<256x9xf32>, vector<8x9xf32> -> vector<8x9xf32>
    %cst_17 = arith.constant dense<0.000000e+00> : vector<32x9xf32>
    %18 = tpu.matmul %6, %17, %cst_17 {dimension_numbers = #tpu.dot_dimension_numbers<[1], [0], [0], [1], [0, 0, 1, 1], [], []>} : vector<32x8xf32>, vector<8x9xf32>, vector<32x9xf32> -> vector<32x9xf32>
    %19 = arith.addf %18, %4 : vector<32x9xf32>
    %c1_18 = arith.constant 1 : index
    %c0_19 = arith.constant 0 : index
    %c0_20 = arith.constant 0 : index
    %20 = vector.load %arg5[%c1_18, %c0_19, %c0_20] : memref<2x32x9xf32, #tpu.memory_space<vmem>>, vector<1x32x9xf32>
    %21 = vector.shape_cast %20 : vector<1x32x9xf32> to vector<32x9xf32>
    %22 = vector.shape_cast %19 : vector<32x9xf32> to vector<1x32x9xf32>
    tpu.vector_store %arg5[%c1_18, %c0_19, %c0_20], %22 {strides = array<i32>} : memref<2x32x9xf32, #tpu.memory_space<vmem>>, vector<1x32x9xf32>,
    return
  }
}

</mosaic_0001>

<bundles_post_ra>
// kernel: model_forward.1
= control target key start
LH: loop header
LB: loop body
LE: loop exit
PB: predicated region body
PF: predicated region fallthrough
CT: control target
= control target key end

     0   :  { %vm163_vm0 = vcmask 64512   ;;  %v613_v51 = vmov 0   ;;  %vm261_vm1 = vcmask 72704   ;;  %s863_s1 = inlined_call_operand.vmem [shape: f32[256,9], index: 1, kind: input, shape index: {}]   ;;  %s864_s0 = inlined_call_operand.vmem [shape: f32[2,8,256], index: 0, kind: input, shape index: {}]   ;;  %s865_s2 = inlined_call_operand.vmem [shape: f32[32,8], index: 2, kind: input, shape index: {}]   ;;  %s866_s3 = inlined_call_operand.vmem [shape: f32[32,1], index: 3, kind: input, shape index: {}]   ;;  %s867_s4 = inlined_call_operand.vmem [shape: f32[1,9], index: 4, kind: input, shape index: {}]   ;;  %s868_s5 = inlined_call_operand.vmem [shape: f32[2,32,9], index: 5, kind: output, shape index: {}]  }
   0x1   :  { %v71_v0 = vld [vmem:[%s863_s1 + $0x80] sm:$0xff]  ;;  %v72_v1 = vld [vmem:[%s863_s1 + $0x88] sm:$0xff]  ;;  %v73_v5 = vld [vmem:[%s863_s1 + $0x90] sm:$0xff]  ;;  %611 = vset.pattern.permute.xlu0 %v613_v51  ;;  %612 = vset.pattern.permute.xlu1 %v613_v51 }
   0x2   :  { %v55_v2 = vld [vmem:[%s863_s1] sm:$0xff]  ;;  %v653_v3 = vpack.c.bf16 %v72_v1, %v71_v0  ;;  %v56_v4 = vld [vmem:[%s863_s1 + $0x8] sm:$0xff]  ;;  %v74_v6 = vld [vmem:[%s863_s1 + $0x98] sm:$0xff] }
   0x3   :  { %v664_v7 = vpack.c.bf16 %v56_v4, %v55_v2  ;;  %v666_v8 = vpack.c.bf16 %v74_v6, %v73_v5  ;;  %v57_v9 = vld [vmem:[%s863_s1 + $0x10] sm:$0xff]  ;;  %v58_v10 = vld [vmem:[%s863_s1 + $0x18] sm:$0xff]  ;;  %v75_v11 = vld [vmem:[%s863_s1 + $0xa0] sm:$0xff] }
   0x4   :  { %545 = vmatprep.subr.bf16.mxu0 %v653_v3  ;;  %v76_v12 = vld [vmem:[%s863_s1 + $0xa8] sm:$0xff]  ;;  %v682_v13 = vpack.c.bf16 %v58_v10, %v57_v9  ;;  %v59_v15 = vld [vmem:[%s863_s1 + $0x20] sm:$0xff]  ;;  %v77_v17 = vld [vmem:[%s863_s1 + $0xb0] sm:$0xff] }
   0x5   :  { %547 = vmatpush3.bf16.msra.mxu0 %v664_v7  ;;  %v685_v14 = vpack.c.bf16 %v76_v12, %v75_v11  ;;  %v60_v16 = vld [vmem:[%s863_s1 + $0x28] sm:$0xff]  ;;  %v78_v18 = vld [vmem:[%s863_s1 + $0xb8] sm:$0xff]  ;;  %v61_v21 = vld [vmem:[%s863_s1 + $0x30] sm:$0xff] }
   0x6   :  { %549 = vmatprep.subr.bf16.mxu0 %v666_v8  ;;  %v700_v19 = vpack.c.bf16 %v60_v16, %v59_v15  ;;  %v703_v20 = vpack.c.bf16 %v78_v18, %v77_v17  ;;  %v62_v22 = vld [vmem:[%s863_s1 + $0x38] sm:$0xff]  ;;  %v79_v23 = vld [vmem:[%s863_s1 + $0xc0] sm:$0xff]  ;;  %v80_v24 = vld [vmem:[%s863_s1 + $0xc8] sm:$0xff] }
   0x7   :  { %v92_v25 = vld [vmem:[%s864_s0 + $0x8] sm:$0xff]  ;;  %v721_v26 = vpack.c.bf16 %v62_v22, %v61_v21  ;;  %v724_v27 = vpack.c.bf16 %v80_v24, %v79_v23  ;;  %v63_v28 = vld [vmem:[%s863_s1 + $0x40] sm:$0xff]  ;;  %v81_v30 = vld [vmem:[%s863_s1 + $0xd0] sm:$0xff] }
   0x8   :  { %157 = vmatprep.mubr.f32.mxu0 %v92_v25  ;;  %v64_v29 = vld [vmem:[%s863_s1 + $0x48] sm:$0xff]  ;;  %v82_v31 = vld [vmem:[%s863_s1 + $0xd8] sm:$0xff]  ;;  %v65_v34 = vld [vmem:[%s863_s1 + $0x50] sm:$0xff] }
   0x9   :  { %551 = vmatpush3.bf16.msra.mxu0 %v682_v13  ;;  %v739_v32 = vpack.c.bf16 %v64_v29, %v63_v28  ;;  %v742_v33 = vpack.c.bf16 %v82_v31, %v81_v30  ;;  %v66_v35 = vld [vmem:[%s863_s1 + $0x58] sm:$0xff]  ;;  %v83_v36 = vld [vmem:[%s863_s1 + $0xe0] sm:$0xff]  ;;  %v84_v37 = vld [vmem:[%s863_s1 + $0xe8] sm:$0xff] }
   0xa   :  { %553 = vmatprep.subr.bf16.mxu0 %v685_v14  ;;  %v566_v38 = vpack.c.bf16 %v66_v35, %v65_v34  ;;  %v568_v39 = vpack.c.bf16 %v84_v37, %v83_v36  ;;  %v67_v40 = vld [vmem:[%s863_s1 + $0x60] sm:$0xff]  ;;  %v68_v41 = vld [vmem:[%s863_s1 + $0x68] sm:$0xff]  ;;  %v85_v42 = vld [vmem:[%s863_s1 + $0xf0] sm:$0xff] }
   0xb   :  { %v86_v43 = vld [vmem:[%s863_s1 + $0xf8] sm:$0xff]  ;;  %v570_v44 = vpack.c.bf16 %v68_v41, %v67_v40  ;;  %v69_v46 = vld [vmem:[%s863_s1 + $0x70] sm:$0xff]  ;;  %v91_v49 = vld [vmem:[%s864_s0] sm:$0xff] }
   0xc   :  { %v572_v45 = vpack.c.bf16 %v86_v43, %v85_v42  ;;  %v70_v47 = vld [vmem:[%s863_s1 + $0x78] sm:$0xff]  ;;  %v87_v50 = vld [vmem:[%s865_s2] sm:$0xff]  ;;  %v22_v53 = vld [vmem:[%s866_s3 + $0x10] sm:$0xff] }
   0xd   :  { %555 = vmatpush3.bf16.msra.mxu0 %v700_v19  ;;  %v574_v48 = vpack.c.bf16 %v70_v47, %v69_v46  ;;  %530 = vmatprep.mubr.msk.f32.mxu1 %vm163_vm0, %v87_v50  ;;  %v20_v52 = vld [vmem:[%s866_s3] sm:$0xff]  ;;  %v21_v54 = vld [vmem:[%s866_s3 + $0x8] sm:$0xff]  ;;  %v23_v55 = vld [vmem:[%s866_s3 + $0x18] sm:$0xff] }
   0xe   :  { %557 = vmatprep.subr.bf16.mxu0 %v703_v20  ;;  %27 = vperm.xlu0 %611, %v20_v52   ;;  %v88_v59 = vld [vmem:[%s865_s2 + $0x8] sm:$0xff]  ;;  %v89_v60 = vld [vmem:[%s865_s2 + $0x10] sm:$0xff]  ;;  %v90_v61 = vld [vmem:[%s865_s2 + $0x18] sm:$0xff] }
   0xf   :  { %37 = vperm.xlu1 %612, %v22_v53   ;;  %v439_v62 = vld [vmem:[%s864_s0 + $0x18] sm:$0xff]  ;;  %v438_v63 = vld [vmem:[%s864_s0 + $0x10] sm:$0xff]  ;;  %v433_v2 = vld [vmem:[%s867_s4] ss:$0 sm:$0xff] }
  0x11   :  { %559 = vmatpush3.bf16.msra.mxu0 %v721_v26 }
  0x12   :  { %561 = vmatprep.subr.bf16.mxu0 %v724_v27  ;;  %32 = vperm.xlu0 %611, %v21_v54  }
  0x13   :  { %42 = vperm.xlu1 %612, %v23_v55  }
  0x15   :  { %563 = vmatpush3.bf16.msra.mxu0 %v739_v32 }
  0x16   :  { %565 = vmatprep.subr.bf16.mxu0 %v742_v33 }
  0x19   :  { %567 = vmatpush3.bf16.msra.mxu0 %v566_v38 }
  0x1a   :  { %569 = vmatprep.subr.bf16.mxu0 %v568_v39 }
  0x1d   :  { %571 = vmatpush3.bf16.msra.mxu0 %v570_v44 }
  0x1e   :  { %573 = vmatprep.subr.bf16.mxu0 %v572_v45 }
  0x21   :  { %575 = vmatpush3.bf16.msra.mxu0 %v574_v48 }
  0x24   :  { %158 = vmatmul.mubr.f32.vlgmr.msra.gmra.mrb[0].mxu0 %v91_v49 }
  0x25   :  { %538 = vmatprep.mubr.msk.f32.mxu0 %vm163_vm0, %v87_v50 }
  0x8d   :  { %v28_v0 = vpop.permute.xlu0 %27 }
  0x8e   :  { %v38_v1 = vpop.permute.xlu1 %37  ;;  %v51_v5 = vmul.f32 %v433_v2, %v28_v0 }
  0x8f   :  { %v53_v12 = vmul.f32 %v433_v2, %v38_v1 }
  0x92   :  { %v43_v6 = vpop.permute.xlu1 %42 }
  0x93   :  { %v54_v10 = vmul.f32 %v433_v2, %v43_v6 }
  0xf7   :  { %v480_v56 = vpop.f32.mrb[0].mxu0 }
  0xf8   :  { %v481_v57 = vpop.f32.mrb[1].mxu0 }
  0xf9   :  { %v482_v58 = vadd.f32 %v481_v57, %v480_v56 }
  0xfb   :  { %528 = vmatprep.subr.mxu1 %v482_v58 }
  0xfc   :  { %529 = vmatpush3.msra.mxu1 %v482_v58 }
  0xfd   :  { %531 = vmatmul.mubr.msk.f32.vlgmr.msra.gmra.mrb[0].mxu1 %vm163_vm0, %v88_v59  ;;  %577 = vmatprep.subr.bf16.mxu1 %v653_v3  ;;  %v33_v3 = vpop.permute.xlu0 %32 }
  0xfe   :  { %579 = vmatpush3.bf16.msra.mxu1 %v664_v7  ;;  %533 = vmatprep.mubr.msk.f32.mxu1 %vm163_vm0, %v89_v60  ;;  %v52_v4 = vmul.f32 %v433_v2, %v33_v3 }
  0xff   :  { %581 = vmatprep.subr.bf16.mxu1 %v666_v8 }
 0x101   :  { %534 = vmatmul.mubr.msk.f32.gmra.mrb[2].mxu1 %vm163_vm0, %v90_v61 }
 0x102   :  { %583 = vmatpush3.bf16.msra.mxu1 %v682_v13  ;;  %333 = vmatprep.mubr.f32.mxu1 %v439_v62 }
 0x103   :  { %585 = vmatprep.subr.bf16.mxu1 %v685_v14 }
 0x106   :  { %587 = vmatpush3.bf16.msra.mxu1 %v700_v19 }
 0x107   :  { %589 = vmatprep.subr.bf16.mxu1 %v703_v20 }
 0x10a   :  { %591 = vmatpush3.bf16.msra.mxu1 %v721_v26 }
 0x10b   :  { %593 = vmatprep.subr.bf16.mxu1 %v724_v27 }
 0x10e   :  { %595 = vmatpush3.bf16.msra.mxu1 %v739_v32 }
 0x10f   :  { %597 = vmatprep.subr.bf16.mxu1 %v742_v33 }
 0x112   :  { %599 = vmatpush3.bf16.msra.mxu1 %v566_v38 }
 0x113   :  { %601 = vmatprep.subr.bf16.mxu1 %v568_v39 }
 0x116   :  { %603 = vmatpush3.bf16.msra.mxu1 %v570_v44 }
 0x117   :  { %605 = vmatprep.subr.bf16.mxu1 %v572_v45 }
 0x11a   :  { %607 = vmatpush3.bf16.msra.mxu1 %v574_v48 }
 0x11d   :  { %334 = vmatmul.mubr.f32.vlgmr.msra.gmra.mrb[4].mxu1 %v438_v63 }
 0x11e   :  { %541 = vmatprep.mubr.msk.f32.mxu1 %vm163_vm0, %v89_v60 }
 0x1d0   :  { %v532_v7 = vpop.f32.mrb[0].mxu1 }
 0x1d1   :  { %v248_v8 = vadd.f32 %v532_v7, %v52_v4  ;;  %v242_v9 = vpop.f32.mrb[1].mxu1 }
 0x1d2   :  { %v243_v11 = vadd.f32 %v242_v9, %v51_v5 }
 0x1d3   :  { %263 = vst.msk [vmem:[%s868_s5 + $0x8] sm:$0xff] %vm261_vm1, %v248_v8 }
 0x1d4   :  { %262 = vst.msk [vmem:[%s868_s5] sm:$0xff] %vm261_vm1, %v243_v11  ;;  %v535_v13 = vpop.f32.mrb[2].mxu1 }
 0x1d5   :  { %v258_v14 = vadd.f32 %v535_v13, %v54_v10  ;;  %v252_v15 = vpop.f32.mrb[3].mxu1 }
 0x1d6   :  { %v253_v16 = vadd.f32 %v252_v15, %v53_v12 }
 0x1d7   :  { %265 = vst.msk [vmem:[%s868_s5 + $0x18] sm:$0xff] %vm261_vm1, %v258_v14 }
 0x1d8   :  { %264 = vst.msk [vmem:[%s868_s5 + $0x10] sm:$0xff] %vm261_vm1, %v253_v16 }
 0x1f0   :  { %v520_v17 = vpop.f32.mrb[4].mxu1 }
 0x1f1   :  { %v521_v18 = vpop.f32.mrb[5].mxu1 }
 0x1f2   :  { %v522_v19 = vadd.f32 %v521_v18, %v520_v17 }
 0x1f4   :  { %536 = vmatprep.subr.mxu0 %v522_v19  ;;  %608 = vmatprep.subr.mxu1 %v522_v19 }
 0x1f5   :  { %537 = vmatpush3.msra.mxu0 %v522_v19  ;;  %609 = vmatpush3.msra.mxu1 %v522_v19 }
 0x1f6   :  { %539 = vmatmul.mubr.msk.f32.vlgmr.msra.gmra.mrb[2].mxu0 %vm163_vm0, %v88_v59  ;;  %542 = vmatmul.mubr.msk.f32.vlgmr.msra.gmra.mrb[6].mxu1 %vm163_vm0, %v90_v61 }
 0x2c9   :  { %v540_v20 = vpop.f32.mrb[2].mxu0  ;;  %v543_v21 = vpop.f32.mrb[6].mxu1 }
 0x2ca   :  { %v411_v22 = vadd.f32 %v540_v20, %v52_v4  ;;  %v421_v23 = vadd.f32 %v543_v21, %v54_v10  ;;  %v405_v24 = vpop.f32.mrb[3].mxu0  ;;  %v415_v25 = vpop.f32.mrb[7].mxu1 }
 0x2cb   :  { %v406_v26 = vadd.f32 %v405_v24, %v51_v5  ;;  %v416_v27 = vadd.f32 %v415_v25, %v53_v12 }
 0x2cc   :  { %445 = vst.msk [vmem:[%s868_s5 + $0x28] sm:$0xff] %vm261_vm1, %v411_v22  ;;  %447 = vst.msk [vmem:[%s868_s5 + $0x38] sm:$0xff] %vm261_vm1, %v421_v23 }
 0x2cd   :  { %444 = vst.msk [vmem:[%s868_s5 + $0x20] sm:$0xff] %vm261_vm1, %v406_v26  ;;  %446 = vst.msk [vmem:[%s868_s5 + $0x30] sm:$0xff] %vm261_vm1, %v416_v27 }

</bundles_post_ra>
